<compile_context>
chip_gen: v7x
topology: tpu7x:2x2x1
jax: 0.10.0
libtpu: 0.0.40
codegen_flags: <defaults>
</compile_context>

<pallas_src>
import functools
import math

import jax
import jax.numpy as jnp
from jax import lax
from jax.experimental import pallas as pl
from jax.experimental.pallas import tpu as pltpu

# ----------------------------- hyper params (small, synthetic) ----------------
B = 2            # batch
T_TXT = 8        # phoneme tokens
T_MEL = 16       # mel frames
T_NOTE = 6       # notes
H = 32           # hidden_size
H_NOTE = 16      # note encoder hidden
R_BINS = 8       # repeat_bins
R_PAD = 128      # lane-dense padded repeat-bin axis
C_RES = 32       # residual_channels of denoiser
VOCAB = 10
N_SPK = 3
SPEC_MIN, SPEC_MAX = -8.0, 8.0
CLAMP_MIN, CLAMP_MAX = -12.0, 12.0

H4 = 4 * H              # 128
HN4 = 4 * H_NOTE        # 64
N_PH = B * T_TXT        # 16 rows of enc_out
N_NT = B * T_NOTE       # 12 rows of note_out
N_MEL = B * T_MEL       # 32 mel rows (sublane axis)
SRC_PAD = 32            # padded source rows for the fused gather (>= N_PH + N_NT)
ACT_ROWS = 64           # activation slab rows: [enc_in | note_in | pad | cond_extra]
_O_EXTRA = 32           # cond_extra row offset inside the activation slab

# weight-slab row offsets (all matrices stacked along rows, 128 lanes wide, bf16)
_O_EW1 = 0                      # enc_w1  (H,   4H)   = (32, 128)
_O_EW2 = _O_EW1 + H             # enc_w2  (4H,  H)    = (128, 32)
_O_NW1 = _O_EW2 + H4            # note_w1 (Hn,  4Hn)  = (16, 64)
_O_NW2 = _O_NW1 + H_NOTE        # note_w2 (4Hn, Hn)   = (64, 16)
_O_NOW = _O_NW2 + HN4           # note_out_w (Hn, H)  = (16, 32)
_O_WIN = _O_NOW + H_NOTE        # win     (R_PAD, C)  = (128, 32)
_O_WC = _O_WIN + R_PAD          # wc      (H, C)      = (32, 32)
_O_WOUT = _O_WC + H             # wout    (C, R_PAD)  = (32, 128)
W_ROWS = _O_WOUT + C_RES        # 448 rows total


# ----------------------------- fused Pallas kernel -----------------------------
def _fused_kernel(infer_step, gidx_ref, acts_ref, x0_ref, w_ref, b_ref, o_ref):
    f32, bf16 = jnp.float32, jnp.bfloat16
    b = b_ref[...]                                          # (8, 128) f32 bias slab

    # ---- FastspeechEncoder surrogate: residual FFN over (B*T_txt, H) ----
    xi = acts_ref[0:N_PH, :]                                # (16, 32) bf16
    ew1 = w_ref[_O_EW1:_O_EW1 + H, :]                       # (32, 128) bf16
    ew2 = w_ref[_O_EW2:_O_EW2 + H4, 0:H]                    # (128, 32) bf16
    h = jnp.dot(xi, ew1, preferred_element_type=f32) + b[0:1, :]
    h = jnp.maximum(h, 0.0)
    enc_out = (xi.astype(f32)
               + jnp.dot(h.astype(bf16), ew2, preferred_element_type=f32)
               + b[1:2, 0:H])                               # (16, 32) f32

    # ---- NoteEncoder surrogate + note_encode_out_linear over (B*T_note, .) ----
    ni = acts_ref[N_PH:N_PH + N_NT, 0:H_NOTE]               # (12, 16) bf16
    nw1 = w_ref[_O_NW1:_O_NW1 + H_NOTE, 0:HN4]
    nw2 = w_ref[_O_NW2:_O_NW2 + HN4, 0:H_NOTE]
    now_w = w_ref[_O_NOW:_O_NOW + H_NOTE, 0:H]
    nh = jnp.dot(ni, nw1, preferred_element_type=f32) + b[2:3, 0:HN4]
    nh = jnp.maximum(nh, 0.0)
    nh = (ni.astype(f32)
          + jnp.dot(nh.astype(bf16), nw2, preferred_element_type=f32)
          + b[3:4, 0:H_NOTE])
    note_out = jnp.dot(nh.astype(bf16), now_w, preferred_element_type=f32) + b[4:5, 0:H]

    # ---- fused gather: one "two-hot" matmul against [enc_out ; note_out] ----
    # torch.gather(F.pad(enc_out,[0,0,1,0]), mel2ph) + the same for mel2note; the -1
    # index (mel2x == 0) matches no iota column -> contributes zeros, i.e. the pad row.
    src = jnp.concatenate(
        [enc_out, note_out, jnp.zeros((SRC_PAD - N_PH - N_NT, H), f32)], axis=0)  # (32,32)
    gidx = gidx_ref[...]                                    # (32, 2) int32
    iota = lax.broadcasted_iota(jnp.int32, (N_MEL, SRC_PAD), 1)
    twohot = ((iota == gidx[:, 0:1]) | (iota == gidx[:, 1:2])).astype(bf16)
    cond = jnp.dot(twohot, src.astype(bf16), preferred_element_type=f32)
    cond = cond + acts_ref[_O_EXTRA:_O_EXTRA + N_MEL, :].astype(f32)   # spk+retake+dpitch

    # ---- rectified-flow Euler sampling, fully VMEM/vreg resident ----
    wc = w_ref[_O_WC:_O_WC + H, 0:C_RES]                    # (32, 32) bf16
    win = w_ref[_O_WIN:_O_WIN + R_PAD, 0:C_RES]             # (128, 32) bf16
    wout = w_ref[_O_WOUT:_O_WOUT + C_RES, :]                # (32, 128) bf16
    cond_proj = jnp.dot(cond.astype(bf16), wc, preferred_element_type=f32) + b[5:6, 0:C_RES]

    dt = 1.0 / infer_step
    wout_dt = (wout.astype(f32) * jnp.float32(dt)).astype(bf16)   # fold dt into wout
    bout_dt = b[6:7, :] * jnp.float32(dt)                          # fold dt into bout
    tvec = b[7:8, 0:C_RES]
    # per-step constants (independent of x) hoisted out of the unrolled loop
    step_bias = [cond_proj + jnp.float32(i * dt) * tvec for i in range(infer_step)]

    x = x0_ref[...]                                         # (32, 128) f32 state
    for i in range(infer_step):                             # static unroll (infer_step static)
        hh = jnp.dot(x.astype(bf16), win, preferred_element_type=f32) + step_bias[i]
        hh = jnp.tanh(hh) * jax.nn.sigmoid(hh)              # simplified WaveNet gate
        x = x + jnp.dot(hh.astype(bf16), wout_dt, preferred_element_type=f32) + bout_dt

    o_ref[...] = x                                          # lane-dense (32, 128) store


def fused_pitch_call(operands, infer_step, out_rows):
    # Single invocation (no grid): nothing to pipeline, so each operand is exactly one
    # whole-array VMEM DMA with no double-buffering.
    vmem = pltpu.MemorySpace.VMEM
    return pl.pallas_call(
        functools.partial(_fused_kernel, infer_step),
        out_shape=jax.ShapeDtypeStruct((out_rows, R_PAD), jnp.float32),
        in_specs=[pl.BlockSpec(memory_space=vmem) for _ in operands],
        out_specs=pl.BlockSpec(memory_space=vmem),
    )(*operands)


# ----------------------------- plain JAX glue ----------------------------------
def mel2ph_to_dur(mel2x, n_tokens):
    # dur[b, i] = number of frames mapped to token i+1 (index 0 is padding)
    return jnp.sum(
        mel2x[:, :, None] == (1 + jnp.arange(n_tokens))[None, None, :], axis=1
    ).astype(jnp.float32)


@functools.partial(jax.jit, static_argnames=("infer_step",))
def pitch_predictor_forward(params, txt_tokens, mel2ph, note_midi, note_rest,
                            mel2note, base_pitch, spk_id, noise_key, infer_step=4):
    Bv, Tt = txt_tokens.shape
    Tm = mel2ph.shape[1]
    Tn = note_midi.shape[1]

    # ---- dur embedding (Linear(1,H)) + token embedding -> encoder input ----
    dur = mel2ph_to_dur(mel2ph, Tt)
    dur_emb = dur[:, :, None] * params["dur_w"] + params["dur_b"]
    tok_emb = params["tok_emb"][txt_tokens] * math.sqrt(H)
    enc_in = (tok_emb + dur_emb).reshape(Bv * Tt, H)

    # ---- note encoder input (midi/rest/dur embeds) ----
    note_dur = mel2ph_to_dur(mel2note, Tn)
    rest_f = note_rest.astype(jnp.float32)[:, :, None]
    midi_emb = note_midi[:, :, None] * params["midi_w"] + params["midi_b"]
    note_in = (midi_emb * (1.0 - rest_f)
               + params["rest_emb"][note_rest.astype(jnp.int32)]
               + note_dur[:, :, None] * params["ndur_w"] + params["ndur_b"]
               ).reshape(Bv * Tn, H_NOTE)

    # ---- fused gather indices: phoneme in col 0, note (offset by N_PH) in col 1 ----
    boff_ph = (jnp.arange(Bv, dtype=jnp.int32) * Tt)[:, None]
    gidx_ph = jnp.where(mel2ph > 0, boff_ph + mel2ph - 1, -1)
    boff_nt = (jnp.arange(Bv, dtype=jnp.int32) * Tn)[:, None]
    gidx_nt = jnp.where(mel2note > 0, N_PH + boff_nt + mel2note - 1, -1)
    gidx = jnp.stack([gidx_ph.reshape(-1), gidx_nt.reshape(-1)], axis=1).astype(jnp.int32)

    # ---- spk / retake / delta-pitch embeddings summed into one addend ----
    # pitch_retake is None in the reference forward -> retake index 1 everywhere,
    # delta_pitch = zeros (matches the PyTorch None-branch exactly).
    spk = params["spk_emb"][spk_id][:, None, :]
    pitch_retake = jnp.ones_like(mel2note, dtype=jnp.int32)
    retake_emb = params["retake_emb"][pitch_retake]
    delta_pitch = jnp.zeros_like(base_pitch)
    dpe = delta_pitch[:, :, None] * params["dp_w"] + params["dp_b"]
    cond_extra = (spk + retake_emb + dpe).reshape(Bv * Tm, H)

    # ---- pack the three activation inputs into ONE bf16 slab ----
    acts = jnp.zeros((ACT_ROWS, H), jnp.bfloat16)
    acts = acts.at[0:N_PH, :].set(enc_in.astype(jnp.bfloat16))
    acts = acts.at[N_PH:N_PH + N_NT, 0:H_NOTE].set(note_in.astype(jnp.bfloat16))
    acts = acts.at[_O_EXTRA:_O_EXTRA + N_MEL, :].set(cond_extra.astype(jnp.bfloat16))

    # ---- initial rectified-flow noise, lane-padded R_BINS -> R_PAD ----
    x0 = jax.random.normal(noise_key, (Bv * Tm, R_BINS), dtype=jnp.float32)
    x0 = jnp.pad(x0, ((0, 0), (0, R_PAD - R_BINS)))

    x = fused_pitch_call((gidx, acts, x0, params["w_slab"], params["b_slab"]),
                         infer_step, Bv * Tm)

    # ---- denormalize, average repeat bins, clamp (tiny glue) ----
    x = x[:, :R_BINS].reshape(Bv, Tm, R_BINS)
    spec = (x + 1.0) * 0.5 * (SPEC_MAX - SPEC_MIN) + SPEC_MIN
    delta = jnp.mean(spec, axis=-1)
    return jnp.clip(delta, CLAMP_MIN, CLAMP_MAX)


# ----------------------------- deterministic params ----------------------------
def init_params(key):
    ks = jax.random.split(key, 20)

    def n(k, shape, scale=0.02):
        return (scale * jax.random.normal(k, shape)).astype(jnp.float32)

    z = lambda *s: jnp.zeros(s, jnp.float32)
    p = {}
    p["tok_emb"] = n(ks[0], (VOCAB + 1, H))
    p["dur_w"], p["dur_b"] = n(ks[1], (H,)), z(H)
    enc_w1, enc_b1 = n(ks[2], (H, H4)), z(1, H4)
    enc_w2, enc_b2 = n(ks[3], (H4, H)), z(1, H)
    p["midi_w"], p["midi_b"] = n(ks[4], (H_NOTE,)), z(H_NOTE)
    p["ndur_w"], p["ndur_b"] = n(ks[5], (H_NOTE,)), z(H_NOTE)
    p["rest_emb"] = n(ks[6], (2, H_NOTE))
    note_w1, note_b1 = n(ks[7], (H_NOTE, HN4)), z(1, HN4)
    note_w2, note_b2 = n(ks[8], (HN4, H_NOTE)), z(1, H_NOTE)
    note_out_w, note_out_b = n(ks[9], (H_NOTE, H)), z(1, H)
    p["spk_emb"] = n(ks[10], (N_SPK, H))
    p["retake_emb"] = n(ks[11], (2, H))
    p["dp_w"], p["dp_b"] = n(ks[12], (H,)), z(H)
    # denoiser weights, zero-padded on the repeat-bin axis to R_PAD=128 lanes (inert:
    # padded win rows / wout columns are zero, so padded lanes of the state stay zero).
    win_p = jnp.zeros((R_PAD, C_RES), jnp.float32).at[:R_BINS].set(n(ks[13], (R_BINS, C_RES)))
    wc = n(ks[14], (H, C_RES))
    bh = z(1, C_RES)
    wout_p = jnp.zeros((C_RES, R_PAD), jnp.float32).at[:, :R_BINS].set(n(ks[15], (C_RES, R_BINS)))
    bout_p = z(1, R_PAD)
    t_vec = n(ks[16], (1, C_RES))

    # ---- pack ALL matmul weights into one bf16 (W_ROWS, 128) slab ----
    w = jnp.zeros((W_ROWS, 128), jnp.float32)
    w = w.at[_O_EW1:_O_EW1 + H, 0:H4].set(enc_w1)
    w = w.at[_O_EW2:_O_EW2 + H4, 0:H].set(enc_w2)
    w = w.at[_O_NW1:_O_NW1 + H_NOTE, 0:HN4].set(note_w1)
    w = w.at[_O_NW2:_O_NW2 + HN4, 0:H_NOTE].set(note_w2)
    w = w.at[_O_NOW:_O_NOW + H_NOTE, 0:H].set(note_out_w)
    w = w.at[_O_WIN:_O_WIN + R_PAD, 0:C_RES].set(win_p)
    w = w.at[_O_WC:_O_WC + H, 0:C_RES].set(wc)
    w = w.at[_O_WOUT:_O_WOUT + C_RES, 0:R_PAD].set(wout_p)
    p["w_slab"] = w.astype(jnp.bfloat16)

    # ---- pack all (1, .) biases + t-vector into one f32 (8, 128) slab ----
    bslab = jnp.zeros((8, 128), jnp.float32)
    bslab = bslab.at[0, 0:H4].set(enc_b1[0])
    bslab = bslab.at[1, 0:H].set(enc_b2[0])
    bslab = bslab.at[2, 0:HN4].set(note_b1[0])
    bslab = bslab.at[3, 0:H_NOTE].set(note_b2[0])
    bslab = bslab.at[4, 0:H].set(note_out_b[0])
    bslab = bslab.at[5, 0:C_RES].set(bh[0])
    bslab = bslab.at[6, 0:R_PAD].set(bout_p[0])
    bslab = bslab.at[7, 0:C_RES].set(t_vec[0])
    p["b_slab"] = bslab
    return p


# ----------------------------- main --------------------------------------------
if __name__ == "__main__":
    key = jax.random.PRNGKey(0)
    pkey, nkey = jax.random.split(key)
    params = init_params(pkey)

    txt_tokens = jnp.array([[1, 2, 3, 4, 5, 6, 7, 8],
                            [2, 3, 4, 5, 6, 7, 0, 0]], dtype=jnp.int32)
    mel2ph = jnp.array([
        [1, 1, 2, 2, 3, 3, 4, 4, 5, 5, 6, 6, 7, 7, 8, 8],
        [1, 1, 1, 2, 2, 3, 3, 4, 4, 5, 5, 6, 6, 0, 0, 0]], dtype=jnp.int32)
    note_midi = jnp.array([[60., 62., 64., 65., 67., 69.],
                           [57., 59., 60., 62., 0., 0.]], dtype=jnp.float32)
    note_rest = jnp.array([[0, 0, 0, 1, 0, 0],
                           [0, 1, 0, 0, 0, 0]], dtype=jnp.int32)
    mel2note = jnp.array([
        [1, 1, 1, 2, 2, 2, 3, 3, 3, 4, 4, 4, 5, 5, 6, 6],
        [1, 1, 2, 2, 2, 3, 3, 3, 4, 4, 4, 4, 0, 0, 0, 0]], dtype=jnp.int32)
    base_pitch = 60.0 + jnp.zeros((B, T_MEL), jnp.float32)
    spk_id = jnp.array([0, 2], dtype=jnp.int32)

    pitch_pred = pitch_predictor_forward(
        params, txt_tokens, mel2ph, note_midi, note_rest, mel2note,
        base_pitch, spk_id, nkey, infer_step=4)
    jax.block_until_ready(pitch_pred)
    assert pitch_pred.shape == (B, T_MEL)
    assert bool(jnp.all(jnp.isfinite(pitch_pred)))
    print("KERNEL_OK")
</pallas_src>

<mosaic_0001>
module attributes {stable_mosaic.version = 11 : i64} {
  func.func @_fused_kernel(%arg0: memref<32x2xi32, #tpu.memory_space<vmem>>, %arg1: memref<64x32xbf16, #tpu.memory_space<vmem>>, %arg2: memref<32x128xf32, #tpu.memory_space<vmem>>, %arg3: memref<448x128xbf16, #tpu.memory_space<vmem>>, %arg4: memref<8x128xf32, #tpu.memory_space<vmem>>, %arg5: memref<32x128xf32, #tpu.memory_space<vmem>>) attributes {dimension_semantics = [], scalar_prefetch = 0 : i64, scratch_operands = 0 : i64, tpu.core_type = #tpu.core_type<tc>} {
    %c0 = arith.constant 0 : index
    %c0_0 = arith.constant 0 : index
    %0 = vector.load %arg4[%c0, %c0_0] : memref<8x128xf32, #tpu.memory_space<vmem>>, vector<8x128xf32>
    %c0_1 = arith.constant 0 : index
    %c0_2 = arith.constant 0 : index
    %1 = vector.load %arg1[%c0_1, %c0_2] : memref<64x32xbf16, #tpu.memory_space<vmem>>, vector<16x32xbf16>
    %c0_3 = arith.constant 0 : index
    %c0_4 = arith.constant 0 : index
    %2 = vector.load %arg3[%c0_3, %c0_4] : memref<448x128xbf16, #tpu.memory_space<vmem>>, vector<32x128xbf16>
    %c32 = arith.constant 32 : index
    %c0_5 = arith.constant 0 : index
    %3 = vector.load %arg3[%c32, %c0_5] : memref<448x128xbf16, #tpu.memory_space<vmem>>, vector<128x32xbf16>
    %cst = arith.constant dense<0.000000e+00> : vector<16x128xf32>
    %4 = tpu.matmul %1, %2, %cst {dimension_numbers = #tpu.dot_dimension_numbers<[1], [0], [0], [1], [0, 0, 1, 1], [], []>} : vector<16x32xbf16>, vector<32x128xbf16>, vector<16x128xf32> -> vector<16x128xf32>
    %5 = vector.extract_strided_slice %0 {offsets = [0, 0], sizes = [1, 128], strides = [1, 1]} : vector<8x128xf32> to vector<1x128xf32>
    %6 = vector.broadcast %5 : vector<1x128xf32> to vector<16x128xf32>
    %7 = arith.addf %4, %6 : vector<16x128xf32>
    %cst_6 = arith.constant 0.000000e+00 : f32
    %8 = vector.broadcast %cst_6 : f32 to vector<16x128xf32>
    %9 = arith.maximumf %7, %8 : vector<16x128xf32>
    %10 = arith.extf %1 : vector<16x32xbf16> to vector<16x32xf32>
    %11 = arith.truncf %9 : vector<16x128xf32> to vector<16x128xbf16>
    %cst_7 = arith.constant dense<0.000000e+00> : vector<16x32xf32>
    %12 = tpu.matmul %11, %3, %cst_7 {dimension_numbers = #tpu.dot_dimension_numbers<[1], [0], [0], [1], [0, 0, 1, 1], [], []>} : vector<16x128xbf16>, vector<128x32xbf16>, vector<16x32xf32> -> vector<16x32xf32>
    %13 = arith.addf %10, %12 : vector<16x32xf32>
    %14 = vector.extract_strided_slice %0 {offsets = [1, 0], sizes = [1, 32], strides = [1, 1]} : vector<8x128xf32> to vector<1x32xf32>
    %15 = vector.broadcast %14 : vector<1x32xf32> to vector<16x32xf32>
    %16 = arith.addf %13, %15 : vector<16x32xf32>
    %c16 = arith.constant 16 : index
    %c0_8 = arith.constant 0 : index
    %17 = vector.load %arg1[%c16, %c0_8] : memref<64x32xbf16, #tpu.memory_space<vmem>>, vector<12x16xbf16>
    %c160 = arith.constant 160 : index
    %c0_9 = arith.constant 0 : index
    %18 = vector.load %arg3[%c160, %c0_9] : memref<448x128xbf16, #tpu.memory_space<vmem>>, vector<16x64xbf16>
    %c176 = arith.constant 176 : index
    %c0_10 = arith.constant 0 : index
    %19 = vector.load %arg3[%c176, %c0_10] : memref<448x128xbf16, #tpu.memory_space<vmem>>, vector<64x16xbf16>
    %c240 = arith.constant 240 : index
    %c0_11 = arith.constant 0 : index
    %20 = vector.load %arg3[%c240, %c0_11] : memref<448x128xbf16, #tpu.memory_space<vmem>>, vector<16x32xbf16>
    %cst_12 = arith.constant dense<0.000000e+00> : vector<12x64xf32>
    %21 = tpu.matmul %17, %18, %cst_12 {dimension_numbers = #tpu.dot_dimension_numbers<[1], [0], [0], [1], [0, 0, 1, 1], [], []>} : vector<12x16xbf16>, vector<16x64xbf16>, vector<12x64xf32> -> vector<12x64xf32>
    %22 = vector.extract_strided_slice %0 {offsets = [2, 0], sizes = [1, 64], strides = [1, 1]} : vector<8x128xf32> to vector<1x64xf32>
    %23 = vector.broadcast %22 : vector<1x64xf32> to vector<12x64xf32>
    %24 = arith.addf %21, %23 : vector<12x64xf32>
    %cst_13 = arith.constant 0.000000e+00 : f32
    %25 = vector.broadcast %cst_13 : f32 to vector<12x64xf32>
    %26 = arith.maximumf %24, %25 : vector<12x64xf32>
    %27 = arith.extf %17 : vector<12x16xbf16> to vector<12x16xf32>
    %28 = arith.truncf %26 : vector<12x64xf32> to vector<12x64xbf16>
    %cst_14 = arith.constant dense<0.000000e+00> : vector<12x16xf32>
    %29 = tpu.matmul %28, %19, %cst_14 {dimension_numbers = #tpu.dot_dimension_numbers<[1], [0], [0], [1], [0, 0, 1, 1], [], []>} : vector<12x64xbf16>, vector<64x16xbf16>, vector<12x16xf32> -> vector<12x16xf32>
    %30 = arith.addf %27, %29 : vector<12x16xf32>
    %31 = vector.extract_strided_slice %0 {offsets = [3, 0], sizes = [1, 16], strides = [1, 1]} : vector<8x128xf32> to vector<1x16xf32>
    %32 = vector.broadcast %31 : vector<1x16xf32> to vector<12x16xf32>
    %33 = arith.addf %30, %32 : vector<12x16xf32>
    %34 = arith.truncf %33 : vector<12x16xf32> to vector<12x16xbf16>
    %cst_15 = arith.constant dense<0.000000e+00> : vector<12x32xf32>
    %35 = tpu.matmul %34, %20, %cst_15 {dimension_numbers = #tpu.dot_dimension_numbers<[1], [0], [0], [1], [0, 0, 1, 1], [], []>} : vector<12x16xbf16>, vector<16x32xbf16>, vector<12x32xf32> -> vector<12x32xf32>
    %36 = vector.extract_strided_slice %0 {offsets = [4, 0], sizes = [1, 32], strides = [1, 1]} : vector<8x128xf32> to vector<1x32xf32>
    %37 = vector.broadcast %36 : vector<1x32xf32> to vector<12x32xf32>
    %38 = arith.addf %35, %37 : vector<12x32xf32>
    %cst_16 = arith.constant 0.000000e+00 : f32
    %39 = vector.broadcast %cst_16 : f32 to vector<4x32xf32>
    %40 = tpu.concatenate %16, %38, %39 in 0 : vector<16x32xf32>, vector<12x32xf32>, vector<4x32xf32> -> vector<32x32xf32>
    %c0_17 = arith.constant 0 : index
    %c0_18 = arith.constant 0 : index
    %41 = vector.load %arg0[%c0_17, %c0_18] : memref<32x2xi32, #tpu.memory_space<vmem>>, vector<32x2xi32>
    %42 = tpu.iota {dimensions = array<i32: 1>} : vector<32x32xi32>
    %43 = vector.extract_strided_slice %41 {offsets = [0, 0], sizes = [32, 1], strides = [1, 1]} : vector<32x2xi32> to vector<32x1xi32>
    %44 = vector.broadcast %43 : vector<32x1xi32> to vector<32x32xi32>
    %45 = arith.cmpi eq, %42, %44 : vector<32x32xi32>
    %46 = vector.extract_strided_slice %41 {offsets = [0, 1], sizes = [32, 1], strides = [1, 1]} : vector<32x2xi32> to vector<32x1xi32>
    %47 = vector.broadcast %46 : vector<32x1xi32> to vector<32x32xi32>
    %48 = arith.cmpi eq, %42, %47 : vector<32x32xi32>
    %49 = arith.ori %45, %48 : vector<32x32xi1>
    %50 = arith.extui %49 : vector<32x32xi1> to vector<32x32xi32>
    %51 = arith.sitofp %50 : vector<32x32xi32> to vector<32x32xf32>
    %52 = arith.truncf %51 : vector<32x32xf32> to vector<32x32xbf16>
    %53 = arith.truncf %40 : vector<32x32xf32> to vector<32x32xbf16>
    %cst_19 = arith.constant dense<0.000000e+00> : vector<32x32xf32>
    %54 = tpu.matmul %52, %53, %cst_19 {dimension_numbers = #tpu.dot_dimension_numbers<[1], [0], [0], [1], [0, 0, 1, 1], [], []>} : vector<32x32xbf16>, vector<32x32xbf16>, vector<32x32xf32> -> vector<32x32xf32>
    %c32_20 = arith.constant 32 : index
    %c0_21 = arith.constant 0 : index
    %55 = vector.load %arg1[%c32_20, %c0_21] : memref<64x32xbf16, #tpu.memory_space<vmem>>, vector<32x32xbf16>
    %56 = arith.extf %55 : vector<32x32xbf16> to vector<32x32xf32>
    %57 = arith.addf %54, %56 : vector<32x32xf32>
    %c384 = arith.constant 384 : index
    %c0_22 = arith.constant 0 : index
    %58 = vector.load %arg3[%c384, %c0_22] : memref<448x128xbf16, #tpu.memory_space<vmem>>, vector<32x32xbf16>
    %c256 = arith.constant 256 : index
    %c0_23 = arith.constant 0 : index
    %59 = vector.load %arg3[%c256, %c0_23] : memref<448x128xbf16, #tpu.memory_space<vmem>>, vector<128x32xbf16>
    %c416 = arith.constant 416 : index
    %c0_24 = arith.constant 0 : index
    %60 = vector.load %arg3[%c416, %c0_24] : memref<448x128xbf16, #tpu.memory_space<vmem>>, vector<32x128xbf16>
    %61 = arith.truncf %57 : vector<32x32xf32> to vector<32x32xbf16>
    %cst_25 = arith.constant dense<0.000000e+00> : vector<32x32xf32>
    %62 = tpu.matmul %61, %58, %cst_25 {dimension_numbers = #tpu.dot_dimension_numbers<[1], [0], [0], [1], [0, 0, 1, 1], [], []>} : vector<32x32xbf16>, vector<32x32xbf16>, vector<32x32xf32> -> vector<32x32xf32>
    %63 = vector.extract_strided_slice %0 {offsets = [5, 0], sizes = [1, 32], strides = [1, 1]} : vector<8x128xf32> to vector<1x32xf32>
    %64 = vector.broadcast %63 : vector<1x32xf32> to vector<32x32xf32>
    %65 = arith.addf %62, %64 : vector<32x32xf32>
    %66 = arith.extf %60 : vector<32x128xbf16> to vector<32x128xf32>
    %cst_26 = arith.constant 2.500000e-01 : f32
    %67 = vector.broadcast %cst_26 : f32 to vector<32x128xf32>
    %68 = arith.mulf %66, %67 : vector<32x128xf32>
    %69 = arith.truncf %68 : vector<32x128xf32> to vector<32x128xbf16>
    %70 = vector.extract_strided_slice %0 {offsets = [6, 0], sizes = [1, 128], strides = [1, 1]} : vector<8x128xf32> to vector<1x128xf32>
    %cst_27 = arith.constant 2.500000e-01 : f32
    %71 = vector.broadcast %cst_27 : f32 to vector<1x128xf32>
    %72 = arith.mulf %70, %71 : vector<1x128xf32>
    %73 = vector.extract_strided_slice %0 {offsets = [7, 0], sizes = [1, 32], strides = [1, 1]} : vector<8x128xf32> to vector<1x32xf32>
    %cst_28 = arith.constant 0.000000e+00 : f32
    %74 = vector.broadcast %cst_28 : f32 to vector<1x32xf32>
    %75 = arith.mulf %74, %73 : vector<1x32xf32>
    %76 = vector.broadcast %75 : vector<1x32xf32> to vector<32x32xf32>
    %77 = arith.addf %65, %76 : vector<32x32xf32>
    %cst_29 = arith.constant 2.500000e-01 : f32
    %78 = vector.broadcast %cst_29 : f32 to vector<1x32xf32>
    %79 = arith.mulf %78, %73 : vector<1x32xf32>
    %80 = vector.broadcast %79 : vector<1x32xf32> to vector<32x32xf32>
    %81 = arith.addf %65, %80 : vector<32x32xf32>
    %cst_30 = arith.constant 5.000000e-01 : f32
    %82 = vector.broadcast %cst_30 : f32 to vector<1x32xf32>
    %83 = arith.mulf %82, %73 : vector<1x32xf32>
    %84 = vector.broadcast %83 : vector<1x32xf32> to vector<32x32xf32>
    %85 = arith.addf %65, %84 : vector<32x32xf32>
    %cst_31 = arith.constant 7.500000e-01 : f32
    %86 = vector.broadcast %cst_31 : f32 to vector<1x32xf32>
    %87 = arith.mulf %86, %73 : vector<1x32xf32>
    %88 = vector.broadcast %87 : vector<1x32xf32> to vector<32x32xf32>
    %89 = arith.addf %65, %88 : vector<32x32xf32>
    %c0_32 = arith.constant 0 : index
    %c0_33 = arith.constant 0 : index
    %90 = vector.load %arg2[%c0_32, %c0_33] : memref<32x128xf32, #tpu.memory_space<vmem>>, vector<32x128xf32>
    %91 = arith.truncf %90 : vector<32x128xf32> to vector<32x128xbf16>
    %cst_34 = arith.constant dense<0.000000e+00> : vector<32x32xf32>
    %92 = tpu.matmul %91, %59, %cst_34 {dimension_numbers = #tpu.dot_dimension_numbers<[1], [0], [0], [1], [0, 0, 1, 1], [], []>} : vector<32x128xbf16>, vector<128x32xbf16>, vector<32x32xf32> -> vector<32x32xf32>
    %93 = arith.addf %92, %77 : vector<32x32xf32>
    %94 = math.tanh %93 : vector<32x32xf32>
    %95 = arith.negf %93 : vector<32x32xf32>
    %96 = math.exp %95 : vector<32x32xf32>
    %cst_35 = arith.constant 1.000000e+00 : f32
    %97 = vector.broadcast %cst_35 : f32 to vector<32x32xf32>
    %98 = arith.addf %97, %96 : vector<32x32xf32>
    %99 = arith.divf %97, %98 : vector<32x32xf32>
    %100 = arith.mulf %94, %99 : vector<32x32xf32>
    %101 = arith.truncf %100 : vector<32x32xf32> to vector<32x32xbf16>
    %cst_36 = arith.constant dense<0.000000e+00> : vector<32x128xf32>
    %102 = tpu.matmul %101, %69, %cst_36 {dimension_numbers = #tpu.dot_dimension_numbers<[1], [0], [0], [1], [0, 0, 1, 1], [], []>} : vector<32x32xbf16>, vector<32x128xbf16>, vector<32x128xf32> -> vector<32x128xf32>
    %103 = arith.addf %90, %102 : vector<32x128xf32>
    %104 = vector.broadcast %72 : vector<1x128xf32> to vector<32x128xf32>
    %105 = arith.addf %103, %104 : vector<32x128xf32>
    %106 = arith.truncf %105 : vector<32x128xf32> to vector<32x128xbf16>
    %cst_37 = arith.constant dense<0.000000e+00> : vector<32x32xf32>
    %107 = tpu.matmul %106, %59, %cst_37 {dimension_numbers = #tpu.dot_dimension_numbers<[1], [0], [0], [1], [0, 0, 1, 1], [], []>} : vector<32x128xbf16>, vector<128x32xbf16>, vector<32x32xf32> -> vector<32x32xf32>
    %108 = arith.addf %107, %81 : vector<32x32xf32>
    %109 = math.tanh %108 : vector<32x32xf32>
    %110 = arith.negf %108 : vector<32x32xf32>
    %111 = math.exp %110 : vector<32x32xf32>
    %cst_38 = arith.constant 1.000000e+00 : f32
    %112 = vector.broadcast %cst_38 : f32 to vector<32x32xf32>
    %113 = arith.addf %112, %111 : vector<32x32xf32>
    %114 = arith.divf %112, %113 : vector<32x32xf32>
    %115 = arith.mulf %109, %114 : vector<32x32xf32>
    %116 = arith.truncf %115 : vector<32x32xf32> to vector<32x32xbf16>
    %cst_39 = arith.constant dense<0.000000e+00> : vector<32x128xf32>
    %117 = tpu.matmul %116, %69, %cst_39 {dimension_numbers = #tpu.dot_dimension_numbers<[1], [0], [0], [1], [0, 0, 1, 1], [], []>} : vector<32x32xbf16>, vector<32x128xbf16>, vector<32x128xf32> -> vector<32x128xf32>
    %118 = arith.addf %105, %117 : vector<32x128xf32>
    %119 = vector.broadcast %72 : vector<1x128xf32> to vector<32x128xf32>
    %120 = arith.addf %118, %119 : vector<32x128xf32>
    %121 = arith.truncf %120 : vector<32x128xf32> to vector<32x128xbf16>
    %cst_40 = arith.constant dense<0.000000e+00> : vector<32x32xf32>
    %122 = tpu.matmul %121, %59, %cst_40 {dimension_numbers = #tpu.dot_dimension_numbers<[1], [0], [0], [1], [0, 0, 1, 1], [], []>} : vector<32x128xbf16>, vector<128x32xbf16>, vector<32x32xf32> -> vector<32x32xf32>
    %123 = arith.addf %122, %85 : vector<32x32xf32>
    %124 = math.tanh %123 : vector<32x32xf32>
    %125 = arith.negf %123 : vector<32x32xf32>
    %126 = math.exp %125 : vector<32x32xf32>
    %cst_41 = arith.constant 1.000000e+00 : f32
    %127 = vector.broadcast %cst_41 : f32 to vector<32x32xf32>
    %128 = arith.addf %127, %126 : vector<32x32xf32>
    %129 = arith.divf %127, %128 : vector<32x32xf32>
    %130 = arith.mulf %124, %129 : vector<32x32xf32>
    %131 = arith.truncf %130 : vector<32x32xf32> to vector<32x32xbf16>
    %cst_42 = arith.constant dense<0.000000e+00> : vector<32x128xf32>
    %132 = tpu.matmul %131, %69, %cst_42 {dimension_numbers = #tpu.dot_dimension_numbers<[1], [0], [0], [1], [0, 0, 1, 1], [], []>} : vector<32x32xbf16>, vector<32x128xbf16>, vector<32x128xf32> -> vector<32x128xf32>
    %133 = arith.addf %120, %132 : vector<32x128xf32>
    %134 = vector.broadcast %72 : vector<1x128xf32> to vector<32x128xf32>
    %135 = arith.addf %133, %134 : vector<32x128xf32>
    %136 = arith.truncf %135 : vector<32x128xf32> to vector<32x128xbf16>
    %cst_43 = arith.constant dense<0.000000e+00> : vector<32x32xf32>
    %137 = tpu.matmul %136, %59, %cst_43 {dimension_numbers = #tpu.dot_dimension_numbers<[1], [0], [0], [1], [0, 0, 1, 1], [], []>} : vector<32x128xbf16>, vector<128x32xbf16>, vector<32x32xf32> -> vector<32x32xf32>
    %138 = arith.addf %137, %89 : vector<32x32xf32>
    %139 = math.tanh %138 : vector<32x32xf32>
    %140 = arith.negf %138 : vector<32x32xf32>
    %141 = math.exp %140 : vector<32x32xf32>
    %cst_44 = arith.constant 1.000000e+00 : f32
    %142 = vector.broadcast %cst_44 : f32 to vector<32x32xf32>
    %143 = arith.addf %142, %141 : vector<32x32xf32>
    %144 = arith.divf %142, %143 : vector<32x32xf32>
    %145 = arith.mulf %139, %144 : vector<32x32xf32>
    %146 = arith.truncf %145 : vector<32x32xf32> to vector<32x32xbf16>
    %cst_45 = arith.constant dense<0.000000e+00> : vector<32x128xf32>
    %147 = tpu.matmul %146, %69, %cst_45 {dimension_numbers = #tpu.dot_dimension_numbers<[1], [0], [0], [1], [0, 0, 1, 1], [], []>} : vector<32x32xbf16>, vector<32x128xbf16>, vector<32x128xf32> -> vector<32x128xf32>
    %148 = arith.addf %135, %147 : vector<32x128xf32>
    %149 = vector.broadcast %72 : vector<1x128xf32> to vector<32x128xf32>
    %150 = arith.addf %148, %149 : vector<32x128xf32>
    %c0_46 = arith.constant 0 : index
    %c0_47 = arith.constant 0 : index
    %151 = vector.load %arg5[%c0_46, %c0_47] : memref<32x128xf32, #tpu.memory_space<vmem>>, vector<32x128xf32>
    tpu.vector_store %arg5[%c0_46, %c0_47], %150 {strides = array<i32>} : memref<32x128xf32, #tpu.memory_space<vmem>>, vector<32x128xf32>,
    return
  }
}

</mosaic_0001>

<bundles_post_ra>
// kernel: pitch_predictor_forward.1
= control target key start
LH: loop header
LB: loop body
LE: loop exit
PB: predicated region body
PF: predicated region fallthrough
CT: control target
= control target key end

     0   :  { %v1828_v0 = vmov 0.0   ;;  %vm1829_vm0 = vmmov 0   ;;  %vm65_vm1 = vcmask 261120   ;;  %vm241_vm2 = vcmask 130048   ;;  %s2297_s3 = inlined_call_operand.vmem [shape: bf16[448,128], index: 3, kind: input, shape index: {}]   ;;  %s2298_s1 = inlined_call_operand.vmem [shape: bf16[64,32], index: 1, kind: input, shape index: {}]   ;;  %s2299_s4 = inlined_call_operand.vmem [shape: f32[8,128], index: 4, kind: input, shape index: {}]   ;;  %s2300_s0 = inlined_call_operand.vmem [shape: s32[32,2], index: 0, kind: input, shape index: {}]   ;;  %s2301_s2 = inlined_call_operand.vmem [shape: f32[32,128], index: 2, kind: input, shape index: {}]   ;;  %s2302_s5 = inlined_call_operand.vmem [shape: f32[32,128], index: 5, kind: output, shape index: {}]  }
   0x1   :  { %1513 = vmatprep.subr.bf16.mxu0 %v1828_v0  ;;  %v1703_v1 = vld [vmem:[%s2297_s3] sm:$0xff]   ;;  %1517 = vmatprep.mubr.msk.bf16.mxu0 %vm1829_vm0, %v1828_v0  ;;  %v1704_v2 = vld [vmem:[%s2297_s3 + $0x8] sm:$0xff]   ;;  %v1708_v4 = vld [vmem:[%s2297_s3 + $0x10] sm:$0xff]   ;;  %v44_v20 = vlaneseq  ;;  %vm315_vm3 = vcmask 523264   ;;  %v1830_v46 = vmov 1   ;;  %v1831_v47 = vmov 0  }
   0x2   :  { %1521 = vmatprep.subr.bf16.mxu1 %v1828_v0  ;;  %1537 = vmatprep.mubr.msk.bf16.mxu1 %vm1829_vm0, %v1828_v0  ;;  %v1878_v3 = vld [vmem:[%s2298_s1] sm:$0xff]   ;;  %v1706_v5 = vld [vmem:[%s2297_s3 + $0x50] sm:$0xff]   ;;  %v1709_v6 = vld [vmem:[%s2297_s3 + $0x18] sm:$0xff]   ;;  %vm423_vm14 = vcmask 1043456  }
   0x3   :  { %1514 = vmatpush3.bf16.msra.mxu0 %v1703_v1  ;;  %1522 = vmatpush3.bf16.msra.mxu1 %v1708_v4  ;;  %v1895_v7 = vld [vmem:[%s2298_s1 + $0x8] sm:$0xf]  ;;  %v1902_v8 = vld [vmem:[%s2298_s1 + $0xc] sm:$0x3]  ;;  %v1710_v9 = vld [vmem:[%s2297_s3 + $0x20] sm:$0xff]   ;;  %v1953_v21 = vshrl.u32 %v44_v20, 7  ;;  %v112_v52 = vunpack.c.l.bf16 %v1878_v3  ;;  %v113_v54 = vunpack.c.h.bf16 %v1878_v3 }
   0x4   :  { %1515 = vmatprep.subr.bf16.mxu0 %v1828_v0  ;;  %1523 = vmatprep.subr.bf16.mxu1 %v1828_v0  ;;  %v1353_v10 = vcombine.low %v1895_v7, %v1902_v8  ;;  %v1711_v11 = vld [vmem:[%s2297_s3 + $0x28] sm:$0xff]   ;;  %v1712_v12 = vld [vmem:[%s2297_s3 + $0x30] sm:$0xff]   ;;  %v1713_v13 = vld [vmem:[%s2297_s3 + $0x38] sm:$0xff]   ;;  %v288_v1 = vunpack.c.l.bf16 %v1895_v7  ;;  %v430_v7 = vand.u32 127, %v44_v20 }
   0x5   :  { %v1714_v14 = vld [vmem:[%s2297_s3 + $0x40] sm:$0xff]   ;;  %v1715_v15 = vld [vmem:[%s2297_s3 + $0x58] sm:$0xff]   ;;  %v1716_v16 = vld [vmem:[%s2297_s3 + $0x48] sm:$0xff]   ;;  %v46_v22 = vsub.s32 0, %v1953_v21  ;;  %v228_v28 = vsub.s32 2, %v1953_v21  ;;  %1699 = vset.pattern.permute.xlu1 %v1830_v46  ;;  %1698 = vset.pattern.permute.xlu0 %v1831_v47  ;;  %v208_v53 = vsub.s32 1, %v1953_v21 }
   0x6   :  { %v1717_v17 = vld [vmem:[%s2297_s3 + $0x60] sm:$0xff]   ;;  %v1718_v18 = vld [vmem:[%s2297_s3 + $0x68] sm:$0xff]   ;;  %v1719_v19 = vld [vmem:[%s2297_s3 + $0x70] sm:$0xff]  }
   0x7   :  { %1516 = vmatpush3.bf16.msra.mxu0 %v1704_v2  ;;  %1524 = vmatpush3.bf16.msra.mxu1 %v1709_v6  ;;  %v1959_v23 = vld [vmem:[%s2299_s4] sm:$0xff]  ;;  %v1720_v45 = vld [vmem:[%s2297_s3 + $0x78] sm:$0xff]   ;;  %v426_v49 = vld [vmem:[%s2300_s0 + $0x8] sm:$0xff]  ;;  %v364_v2 = vsub.s32 3, %v1953_v21 }
   0x8   :  { %1541 = vmatprep.subr.bf16.mxu0 %v1828_v0  ;;  %1525 = vmatprep.subr.bf16.mxu1 %v1828_v0  ;;  %v47_v24 = vrot.slane %v1959_v23, %v46_v22  ;;  %v229_v34 = vrot.slane %v1959_v23, %v228_v28  ;;  %v425_v48 = vld [vmem:[%s2300_s0] sm:$0xff]  ;;  %v427_v50 = vld [vmem:[%s2300_s0 + $0x10] sm:$0xff]  ;;  %v428_v51 = vld [vmem:[%s2300_s0 + $0x18] sm:$0xff]  ;;  %v209_v57 = vrot.slane %v1959_v23, %v208_v53 }
   0x9   :  { %448 = vperm.xlu1 %1699, %v425_v48   ;;  %432 = vperm.xlu0 %1698, %v425_v48   ;;  %v1729_v48 = vld [vmem:[%s2297_s3 + $0xc8] sm:$0xff]   ;;  %v2076_v53 = vld [vmem:[%s2301_s2 + $0x10] sm:$0xff] }
   0xa   :  { %1518 = vmatmul.mubr.msk.bf16.vlgmr.msra.gmra.mrb[0].mxu0 %vm65_vm1, %v1878_v3  ;;  %v365_v3 = vrot.slane %v1959_v23, %v364_v2 }
   0xb   :  { %1542 = vmatpush3.bf16.msra.mxu0 %v1706_v5  ;;  %1543 = vmatprep.mubr.msk.bf16.mxu0 %vm1829_vm0, %v1828_v0  ;;  %v289_v5 = vunpack.c.l.bf16 %v1902_v8 }
   0xc   :  { %1547 = vmatprep.subr.bf16.mxu0 %v1828_v0  ;;  %1526 = vmatpush3.bf16.msra.mxu1 %v1710_v9 }
   0xd   :  { %1527 = vmatprep.subr.bf16.mxu1 %v1828_v0  ;;  %451 = vperm.xlu1 %1699, %v426_v49  }
   0xe   :  { %435 = vperm.xlu0 %1698, %v426_v49   ;;  %v2057_v49 = vld [vmem:[%s2297_s3 + $0xb8] sm:$0xff]  }
  0x10   :  { %1528 = vmatpush3.bf16.msra.mxu1 %v1711_v11 }
  0x11   :  { %1529 = vmatprep.subr.bf16.mxu1 %v1828_v0  ;;  %1700 = vset.pattern.permute.xlu1 %v1831_v47  ;;  %v2047_v47 = vld [vmem:[%s2297_s3 + $0xb0] sm:$0xff]  }
  0x12   :  { %1544 = vmatmul.mubr.msk.bf16.vlgmr.msra.gmra.mrb[4].mxu0 %vm241_vm2, %v1353_v10  ;;  %438 = vperm.xlu0 %1698, %v427_v50  }
  0x13   :  { %1555 = vmatprep.mubr.msk.bf16.mxu0 %vm1829_vm0, %v1828_v0  ;;  %1548 = vmatpush3.bf16.msra.mxu0 %v1715_v15 }
  0x14   :  { %1530 = vmatpush3.bf16.msra.mxu1 %v1712_v12  ;;  %1549 = vmatprep.subr.bf16.mxu0 %v1828_v0 }
  0x15   :  { %1531 = vmatprep.subr.bf16.mxu1 %v1828_v0  ;;  %441 = vperm.xlu1 %1700, %v428_v51  }
  0x16   :  { %1701 = vset.pattern.permute.xlu0 %v1830_v46 }
  0x17   :  { %1550 = vmatpush3.bf16.msra.mxu0 %v1717_v17  ;;  %454 = vperm.xlu0 %1701, %v427_v50   ;;  %v2063_v50 = vld [vmem:[%s2301_s2] sm:$0xff] }
  0x18   :  { %1532 = vmatpush3.bf16.msra.mxu1 %v1713_v13  ;;  %1551 = vmatprep.subr.bf16.mxu0 %v1828_v0 }
  0x19   :  { %1533 = vmatprep.subr.bf16.mxu1 %v1828_v0  ;;  %1702 = vset.pattern.permute.xlu1 %v1830_v46  ;;  %v1727_v46 = vld [vmem:[%s2297_s3 + $0xc0] sm:$0xff]  }
  0x1a   :  { %457 = vperm.xlu1 %1702, %v428_v51   ;;  %v2068_v51 = vld [vmem:[%s2301_s2 + $0x8] sm:$0xff] }
  0x1b   :  { %1552 = vmatpush3.bf16.msra.mxu0 %v1718_v18 }
  0x1c   :  { %1534 = vmatpush3.bf16.msra.mxu1 %v1714_v14  ;;  %1553 = vmatprep.subr.bf16.mxu0 %v1828_v0 }
  0x1d   :  { %1535 = vmatprep.subr.bf16.mxu1 %v1828_v0 }
  0x1f   :  { %1554 = vmatpush3.bf16.msra.mxu0 %v1719_v19 }
  0x20   :  { %1536 = vmatpush3.bf16.msra.mxu1 %v1716_v16  ;;  %1559 = vmatprep.subr.bf16.mxu0 %v1828_v0 }
  0x88   :  { %v449_v17 = vpop.permute.xlu1 %448  ;;  %v433_v18 = vpop.permute.xlu0 %432 }
  0x89   :  { %vm459_vm4 = vcmp.eq.s32.totalorder %v430_v7, %v449_v17  ;;  %vm443_vm5 = vcmp.eq.s32.totalorder %v430_v7, %v433_v18 }
  0x8a   :  { %vm463_vm6 = vmor %vm443_vm5, %vm459_vm4 }
  0x8b   :  { %v1363_v22 = vsel %vm463_vm6, 1.0, %v1828_v0 }
  0x8c   :  { %v452_v8 = vpop.permute.xlu1 %451 }
  0x8d   :  { %v436_v19 = vpop.permute.xlu0 %435  ;;  %vm460_vm7 = vcmp.eq.s32.totalorder %v430_v7, %v452_v8  ;;  %v1427_v8 = vld [vmem:[%s2297_s3 + $0xd8] sm:$0xff]  }
  0x8e   :  { %vm444_vm8 = vcmp.eq.s32.totalorder %v430_v7, %v436_v19 }
  0x8f   :  { %vm464_vm9 = vmor %vm444_vm8, %vm460_vm7 }
  0x91   :  { %v439_v20 = vpop.permute.xlu0 %438 }
  0x92   :  { %vm445_vm10 = vcmp.eq.s32.totalorder %v430_v7, %v439_v20 }
  0x96   :  { %v455_v28 = vpop.permute.xlu0 %454 }
  0x97   :  { %vm461_vm11 = vcmp.eq.s32.totalorder %v430_v7, %v455_v28  ;;  %v2115_v28 = vmul.f32 0.25, %v1959_v23 }
  0x98   :  { %vm465_vm15 = vmor %vm445_vm10, %vm461_vm11 }
  0xdd   :  { %v103_v25 = vpop.f32.mrb[0].mxu0 }
  0xde   :  { %v104_v26 = vadd.f32 %v103_v25, %v47_v24  ;;  %v1519_v27 = vpop.f32.mrb[1].mxu0 }
  0xdf   :  { %v106_v29 = vpop.f32.mrb[2].mxu0  ;;  %v371_v27 = vsub.s32 4, %v1953_v21 }
  0xe0   :  { %v107_v30 = vadd.f32 %v106_v29, %v47_v24  ;;  %v1520_v31 = vpop.f32.mrb[3].mxu0  ;;  %v110_v32 = vmax.f32 %v104_v26, 0.0  ;;  %v1364_v24 = vsel %vm464_vm9, 1.0, %v1828_v0  ;;  %v442_v26 = vpop.permute.xlu1 %441 }
  0xe1   :  { %v475_v25 = vpack.c.bf16 %v1364_v24, %v1363_v22  ;;  %vm446_vm12 = vcmp.eq.s32.totalorder %v430_v7, %v442_v26  ;;  %v1422_v22 = vunpack.c.l.bf16 %v1427_v8  ;;  %v1423_v24 = vunpack.c.h.bf16 %v1427_v8 }
  0xe2   :  { %v111_v33 = vmax.f32 %v107_v30, 0.0  ;;  %v372_v30 = vrot.slane %v1959_v23, %v371_v27  ;;  %v570_v27 = vsub.s32 5, %v1953_v21 }
  0xe3   :  { %v646_v20 = vmul.f32 0.25, %v1423_v24 }
  0xe4   :  { %v114_v35 = vpack.c.bf16 %v111_v33, %v110_v32  ;;  %v458_v29 = vpop.permute.xlu1 %457 }
  0xe5   :  { %v279_v36 = vpop.f32.mrb[4].mxu0  ;;  %vm462_vm13 = vcmp.eq.s32.totalorder %v430_v7, %v458_v29  ;;  %v650_v29 = vmul.f32 0.0, %v1959_v23 }
  0xe6   :  { %v280_v37 = vadd.f32 %v279_v36, %v229_v34  ;;  %1538 = vmatmul.mubr.bf16.vlgmr.msra.gmra.mrb[0].mxu1 %v114_v35  ;;  %v1545_v38 = vpop.f32.mrb[5].mxu0 }
  0xe7   :  { %v282_v39 = vpop.f32.mrb[6].mxu0  ;;  %1569 = vmatprep.mubr.msk.bf16.mxu1 %vm65_vm1, %v475_v25  ;;  %v1999_v38 = vld [vmem:[%s2297_s3 + $0x80] sm:$0xff]   ;;  %v645_v25 = vmul.f32 0.25, %v1422_v22 }
  0xe8   :  { %v283_v40 = vadd.f32 %v282_v39, %v229_v34  ;;  %v1546_v41 = vpop.f32.mrb[7].mxu0  ;;  %v286_v42 = vmax.f32 %v280_v37, 0.0 }
  0xe9   :  { %v2105_v26 = vpack.c.bf16 %v646_v20, %v645_v25 }
  0xea   :  { %v287_v43 = vmax.f32 %v283_v40, 0.0  ;;  %v1365_v40 = vsel %vm465_vm15, 1.0, %v1828_v0 }
  0xec   :  { %v290_v44 = vpack.c.bf16 %v287_v43, %v286_v42  ;;  %v2007_v42 = vld [vmem:[%s2297_s3 + $0x88] sm:$0xff]   ;;  %v2022_v43 = vld [vmem:[%s2297_s3 + $0x98] sm:$0xff]  }
  0xee   :  { %1556 = vmatmul.mubr.msk.bf16.vlgmr.msra.gmra.mrb[8].mxu0 %vm315_vm3, %v290_v44  ;;  %v2029_v44 = vld [vmem:[%s2297_s3 + $0xa0] sm:$0xff]  }
  0xef   :  { %1561 = vmatprep.mubr.msk.bf16.mxu0 %vm1829_vm0, %v1828_v0  ;;  %1560 = vmatpush3.bf16.msra.mxu0 %v1720_v45  ;;  %vm466_vm0 = vmor %vm446_vm12, %vm462_vm13  ;;  %v2036_v45 = vld [vmem:[%s2297_s3 + $0xa8] sm:$0xff]  }
  0xf0   :  { %v1366_v39 = vsel %vm466_vm0, 1.0, %v1828_v0  ;;  %v2015_v0 = vld [vmem:[%s2297_s3 + $0x90] sm:$0xff]   ;;  %1573 = vmatprep.subr.bf16.mxu0 %v1727_v46 }
  0xf1   :  { %v476_v41 = vpack.c.bf16 %v1366_v39, %v1365_v40 }
 0x1b9   :  { %v197_v55 = vpop.f32.mrb[0].mxu1 }
 0x1ba   :  { %v204_v56 = vadd.f32 %v197_v55, %v112_v52  ;;  %v1539_v58 = vpop.f32.mrb[1].mxu1  ;;  %v689_v52 = vpack.c.bf16 %v2068_v51, %v2063_v50 }
 0x1bb   :  { %v200_v59 = vpop.f32.mrb[2].mxu1 }
 0x1bc   :  { %v205_v60 = vadd.f32 %v200_v59, %v113_v54  ;;  %v1540_v61 = vpop.f32.mrb[3].mxu1  ;;  %v210_v62 = vadd.f32 %v209_v57, %v204_v56  ;;  %v2081_v54 = vld [vmem:[%s2301_s2 + $0x18] sm:$0xff] }
 0x1bd   :  { %v690_v55 = vpack.c.bf16 %v2081_v54, %v2076_v53  ;;  %v1425_v56 = vld [vmem:[%s2298_s1 + $0x18] sm:$0xff]  }
 0x1be   :  { %v211_v63 = vadd.f32 %v209_v57, %v205_v60  ;;  %v1424_v57 = vld [vmem:[%s2298_s1 + $0x10] sm:$0xff]   ;;  %v1414_v58 = vunpack.c.l.bf16 %v1425_v56  ;;  %v1415_v59 = vunpack.c.h.bf16 %v1425_v56 }
 0x1bf   :  { %v1410_v61 = vunpack.c.l.bf16 %v1424_v57 }
 0x1c0   :  { %v477_v4 = vpack.c.bf16 %v211_v63, %v210_v62  ;;  %v1411_v62 = vunpack.c.h.bf16 %v1424_v57 }
 0x1c1   :  { %v353_v6 = vpop.f32.mrb[8].mxu0 }
 0x1c2   :  { %v360_v9 = vadd.f32 %v353_v6, %v288_v1  ;;  %v1557_v10 = vpop.f32.mrb[9].mxu0  ;;  %1565 = vmatprep.subr.bf16.mxu1 %v477_v4 }
 0x1c3   :  { %v356_v11 = vpop.f32.mrb[10].mxu0  ;;  %1566 = vmatpush3.bf16.msra.mxu1 %v477_v4 }
 0x1c4   :  { %v361_v12 = vadd.f32 %v356_v11, %v289_v5  ;;  %v1558_v13 = vpop.f32.mrb[11].mxu0  ;;  %v366_v14 = vadd.f32 %v365_v3, %v360_v9 }
 0x1c6   :  { %v367_v15 = vadd.f32 %v365_v3, %v361_v12 }
 0x1c8   :  { %v368_v16 = vpack.c.bf16 %v367_v15, %v366_v14  ;;  %v1426_v15 = vld [vmem:[%s2297_s3 + $0xd0] sm:$0xff]  }
 0x1c9   :  { %v1419_v7 = vunpack.c.h.bf16 %v1426_v15 }
 0x1ca   :  { %1562 = vmatmul.mubr.msk.bf16.vlgmr.msra.gmra.mrb[12].mxu0 %vm241_vm2, %v368_v16  ;;  %vm1832_vm2 = vmmov 1   ;;  %v1418_v16 = vunpack.c.l.bf16 %v1426_v15 }
 0x1cb   :  { %vm1367_vm3 = vmpackc.low %vm423_vm14, %vm1832_vm2  ;;  %1574 = vmatpush3.bf16.msra.mxu0 %v1727_v46  ;;  %v644_v18 = vmul.f32 0.25, %v1419_v7 }
 0x1cc   :  { %1575 = vmatprep.subr.bf16.mxu0 %v1729_v48  ;;  %v643_v17 = vmul.f32 0.25, %v1418_v16 }
 0x1ce   :  { %v2099_v19 = vpack.c.bf16 %v644_v18, %v643_v17 }
 0x1cf   :  { %1576 = vmatpush3.bf16.msra.mxu0 %v1729_v48 }
 0x1d0   :  { %1601 = vmatprep.subr.bf16.mxu0 %v2099_v19 }
 0x29d   :  { %v416_v31 = vpop.f32.mrb[12].mxu0 }
 0x29e   :  { %v1563_v32 = vpop.f32.mrb[13].mxu0  ;;  %v417_v34 = vadd.f32 %v416_v31, %v372_v30  ;;  %v667_v31 = vmul.f32 0.5, %v1959_v23 }
 0x29f   :  { %v419_v33 = vpop.f32.mrb[14].mxu0  ;;  %v571_v32 = vrot.slane %v1959_v23, %v570_v27 }
 0x2a0   :  { %v420_v35 = vadd.f32 %v419_v33, %v372_v30  ;;  %v1564_v36 = vpop.f32.mrb[15].mxu0  ;;  %v653_v30 = vsub.s32 7, %v1953_v21  ;;  %v676_v33 = vmul.f32 0.75, %v1959_v23 }
 0x2a2   :  { %v1368_v37 = vpack.c.bf16 %v420_v35, %v417_v34  ;;  %v654_v34 = vrot.slane %v650_v29, %v653_v30  ;;  %v662_v35 = vrot.slane %v2115_v28, %v653_v30  ;;  %v671_v36 = vrot.slane %v667_v31, %v653_v30 }
 0x2a3   :  { %v680_v48 = vrot.slane %v676_v33, %v653_v30 }
 0x2a4   :  { %1567 = vmatprep.subr.msk.bf16.mxu1 %vm1367_vm3, %v1368_v37 }
 0x2a5   :  { %1568 = vmatpush3.bf16.msk.msra.mxu1 %vm1367_vm3, %v1368_v37 }
 0x2a6   :  { %1581 = vmatprep.subr.bf16.mxu1 %v1999_v38 }
 0x2a8   :  { %1570 = vmatmul.mubr.msk.bf16.vlgmr.msra.gmra.mrb[4].mxu1 %vm65_vm1, %v476_v41 }
 0x2a9   :  { %1582 = vmatpush3.bf16.msra.mxu1 %v1999_v38  ;;  %1597 = vmatprep.mubr.bf16.mxu1 %v689_v52 }
 0x2aa   :  { %1583 = vmatprep.subr.bf16.mxu1 %v2007_v42 }
 0x2ad   :  { %1584 = vmatpush3.bf16.msra.mxu1 %v2007_v42 }
 0x2ae   :  { %1585 = vmatprep.subr.bf16.mxu1 %v2015_v0 }
 0x2b1   :  { %1586 = vmatpush3.bf16.msra.mxu1 %v2015_v0 }
 0x2b2   :  { %1587 = vmatprep.subr.bf16.mxu1 %v2022_v43 }
 0x2b5   :  { %1588 = vmatpush3.bf16.msra.mxu1 %v2022_v43 }
 0x2b6   :  { %1589 = vmatprep.subr.bf16.mxu1 %v2029_v44 }
 0x2b9   :  { %1590 = vmatpush3.bf16.msra.mxu1 %v2029_v44 }
 0x2ba   :  { %1591 = vmatprep.subr.bf16.mxu1 %v2036_v45 }
 0x2bd   :  { %1592 = vmatpush3.bf16.msra.mxu1 %v2036_v45 }
 0x2be   :  { %1593 = vmatprep.subr.bf16.mxu1 %v2047_v47 }
 0x2c1   :  { %1594 = vmatpush3.bf16.msra.mxu1 %v2047_v47 }
 0x2c2   :  { %1595 = vmatprep.subr.bf16.mxu1 %v2057_v49 }
 0x2c5   :  { %1596 = vmatpush3.bf16.msra.mxu1 %v2057_v49 }
 0x2c6   :  { %1629 = vmatprep.subr.bf16.mxu1 %v2099_v19 }
 0x2c8   :  { %1598 = vmatmul.mubr.bf16.vlgmr.msra.gmra.mrb[8].mxu1 %v690_v55 }
 0x2c9   :  { %1630 = vmatpush3.bf16.msra.mxu1 %v2099_v19 }
 0x2ca   :  { %1631 = vmatprep.subr.bf16.mxu1 %v2105_v26 }
 0x2cd   :  { %1632 = vmatpush3.bf16.msra.mxu1 %v2105_v26 }
 0x2ce   :  { %1637 = vmatprep.subr.bf16.mxu1 %v1999_v38 }
 0x37b   :  { %v1571_v60 = vpop.f32.mrb[4].mxu1 }
 0x37c   :  { %v527_v63 = vpop.f32.mrb[5].mxu1  ;;  %v536_v2 = vadd.f32 %v1571_v60, %v1414_v58 }
 0x37d   :  { %v1572_v1 = vpop.f32.mrb[6].mxu1  ;;  %v528_v6 = vadd.f32 %v1410_v61, %v527_v63 }
 0x37e   :  { %v539_v4 = vadd.f32 %v1572_v1, %v1415_v59  ;;  %v530_v5 = vpop.f32.mrb[7].mxu1 }
 0x37f   :  { %v531_v9 = vadd.f32 %v1411_v62, %v530_v5 }
 0x380   :  { %v567_v3 = vpack.c.bf16 %v539_v4, %v536_v2 }
 0x381   :  { %v566_v10 = vpack.c.bf16 %v531_v9, %v528_v6 }
 0x383   :  { %1577 = vmatprep.mubr.msk.bf16.mxu0 %vm65_vm1, %v566_v10 }
 0x384   :  { %1578 = vmatmul.mubr.msk.bf16.vlgmr.msra.gmra.mrb[16].mxu0 %vm65_vm1, %v567_v3 }
 0x385   :  { %1602 = vmatpush3.bf16.msra.mxu0 %v2099_v19 }
 0x386   :  { %1603 = vmatprep.subr.bf16.mxu0 %v2105_v26 }
 0x389   :  { %1604 = vmatpush3.bf16.msra.mxu0 %v2105_v26 }
 0x38a   :  { %1609 = vmatprep.subr.bf16.mxu0 %v1999_v38 }
 0x39b   :  { %v1599_v11 = vpop.f32.mrb[8].mxu1 }
 0x39c   :  { %v773_v12 = vpop.f32.mrb[9].mxu1 }
 0x39d   :  { %v1600_v13 = vpop.f32.mrb[10].mxu1 }
 0x39e   :  { %v776_v14 = vpop.f32.mrb[11].mxu1 }
 0x457   :  { %v1579_v37 = vpop.f32.mrb[16].mxu0 }
 0x458   :  { %v633_v39 = vadd.f32 %v1579_v37, %v571_v32  ;;  %v624_v40 = vpop.f32.mrb[17].mxu0 }
 0x459   :  { %v625_v41 = vadd.f32 %v624_v40, %v571_v32  ;;  %v1580_v46 = vpop.f32.mrb[18].mxu0 }
 0x45a   :  { %v636_v52 = vadd.f32 %v1580_v46, %v571_v32  ;;  %v657_v55 = vadd.f32 %v654_v34, %v633_v39  ;;  %v627_v56 = vpop.f32.mrb[19].mxu0  ;;  %v2123_v57 = vadd.f32 %v662_v35, %v633_v39  ;;  %v2125_v58 = vadd.f32 %v671_v36, %v633_v39 }
 0x45b   :  { %v628_v59 = vadd.f32 %v627_v56, %v571_v32  ;;  %v655_v60 = vadd.f32 %v654_v34, %v625_v41  ;;  %v2127_v23 = vadd.f32 %v662_v35, %v625_v41  ;;  %v2129_v61 = vadd.f32 %v671_v36, %v625_v41 }
 0x45c   :  { %v782_v62 = vadd.f32 %v1599_v11, %v657_v55  ;;  %v658_v63 = vadd.f32 %v654_v34, %v636_v52  ;;  %v2131_v1 = vadd.f32 %v662_v35, %v636_v52  ;;  %v2133_v2 = vadd.f32 %v671_v36, %v636_v52 }
 0x45d   :  { %v774_v4 = vadd.f32 %v773_v12, %v655_v60  ;;  %v656_v5 = vadd.f32 %v654_v34, %v628_v59  ;;  %v2135_v6 = vadd.f32 %v662_v35, %v628_v59  ;;  %v2137_v9 = vadd.f32 %v671_v36, %v628_v59 }
 0x45e   :  { %v1386_v3 = vmul.f32 -1.442695, %v782_v62  ;;  %v785_v10 = vadd.f32 %v1600_v13, %v658_v63  ;;  %v2139_v15 = vadd.f32 %v680_v48, %v633_v39  ;;  %v2141_v17 = vadd.f32 %v680_v48, %v625_v41 }
 0x45f   :  { %v1384_v16 = vmul.f32 -1.442695, %v774_v4  ;;  %v777_v7 = vadd.f32 %v776_v14, %v656_v5  ;;  %v2143_v18 = vadd.f32 %v680_v48, %v636_v52  ;;  %v2145_v8 = vadd.f32 %v680_v48, %v628_v59 }
 0x460   :  { %1732 = vpow2.f32 %v1386_v3  ;;  %v1387_v11 = vmul.f32 -1.442695, %v785_v10  ;;  %v883_v55 = vsub.s32 6, %v1953_v21 }
 0x461   :  { %1734 = vpow2.f32 %v1384_v16  ;;  %v1385_v12 = vmul.f32 -1.442695, %v777_v7 }
 0x462   :  { %1736 = vpow2.f32 %v1387_v11  ;;  %v2167_v60 = vrot.slane %v2115_v28, %v883_v55 }
 0x463   :  { %1738 = vpow2.f32 %v1385_v12 }
 0x464   :  { %1740 = vtanh.f32 %v782_v62 }
 0x465   :  { %1742 = vtanh.f32 %v774_v4 }
 0x466   :  { %1744 = vtanh.f32 %v785_v10 }
 0x46a   :  { %v1733_v22 = vpop.eup %1732 }
 0x46b   :  { %v1735_v24 = vpop.eup %1734  ;;  %v806_v13 = vadd.f32 1.0, %v1733_v22 }
 0x46c   :  { %v804_v25 = vadd.f32 1.0, %v1735_v24  ;;  %v1737_v20 = vpop.eup %1736 }
 0x46d   :  { %1746 = vrcp.f32 %v806_v13  ;;  %v807_v14 = vadd.f32 1.0, %v1737_v20  ;;  %v1739_v27 = vpop.eup %1738 }
 0x46e   :  { %1748 = vrcp.f32 %v804_v25  ;;  %v805_v29 = vadd.f32 1.0, %v1739_v27  ;;  %v1741_v30 = vpop.eup %1740 }
 0x46f   :  { %1750 = vrcp.f32 %v807_v14  ;;  %v1743_v31 = vpop.eup %1742 }
 0x470   :  { %1752 = vtanh.f32 %v777_v7  ;;  %v1745_v32 = vpop.eup %1744 }
 0x471   :  { %1754 = vrcp.f32 %v805_v29 }
 0x477   :  { %v1747_v33 = vpop.eup %1746 }
 0x478   :  { %v1749_v34 = vpop.eup %1748  ;;  %v818_v37 = vmul.f32 %v1747_v33, %v1741_v30 }
 0x479   :  { %v1751_v35 = vpop.eup %1750  ;;  %v816_v41 = vmul.f32 %v1749_v34, %v1743_v31 }
 0x47a   :  { %v1753_v36 = vpop.eup %1752  ;;  %v819_v39 = vmul.f32 %v1751_v35, %v1745_v32 }
 0x47b   :  { %v1755_v40 = vpop.eup %1754 }
 0x47c   :  { %v817_v46 = vmul.f32 %v1755_v40, %v1753_v36  ;;  %v821_v48 = vpack.c.bf16 %v819_v39, %v818_v37 }
 0x47e   :  { %v820_v52 = vpack.c.bf16 %v817_v46, %v816_v41 }
 0x480   :  { %1605 = vmatprep.mubr.msk.bf16.mxu0 %vm65_vm1, %v820_v52 }
 0x481   :  { %1606 = vmatmul.mubr.msk.bf16.vlgmr.msra.gmra.mrb[20].mxu0 %vm65_vm1, %v821_v48 }
 0x482   :  { %1610 = vmatpush3.bf16.msra.mxu0 %v1999_v38 }
 0x483   :  { %1611 = vmatprep.subr.bf16.mxu0 %v2007_v42 }
 0x486   :  { %1612 = vmatpush3.bf16.msra.mxu0 %v2007_v42 }
 0x487   :  { %1613 = vmatprep.subr.bf16.mxu0 %v2015_v0 }
 0x48a   :  { %1614 = vmatpush3.bf16.msra.mxu0 %v2015_v0 }
 0x48b   :  { %1615 = vmatprep.subr.bf16.mxu0 %v2022_v43 }
 0x48e   :  { %1616 = vmatpush3.bf16.msra.mxu0 %v2022_v43 }
 0x48f   :  { %1617 = vmatprep.subr.bf16.mxu0 %v2029_v44 }
 0x492   :  { %1618 = vmatpush3.bf16.msra.mxu0 %v2029_v44 }
 0x493   :  { %1619 = vmatprep.subr.bf16.mxu0 %v2036_v45 }
 0x496   :  { %1620 = vmatpush3.bf16.msra.mxu0 %v2036_v45 }
 0x497   :  { %1621 = vmatprep.subr.bf16.mxu0 %v2047_v47 }
 0x49a   :  { %1622 = vmatpush3.bf16.msra.mxu0 %v2047_v47 }
 0x49b   :  { %1623 = vmatprep.subr.bf16.mxu0 %v2057_v49 }
 0x49e   :  { %1624 = vmatpush3.bf16.msra.mxu0 %v2057_v49 }
 0x49f   :  { %1657 = vmatprep.subr.bf16.mxu0 %v2099_v19 }
 0x554   :  { %v1607_v56 = vpop.f32.mrb[20].mxu0 }
 0x555   :  { %v862_v59 = vpop.f32.mrb[21].mxu0  ;;  %v879_v4 = vadd.f32 %v1607_v56, %v2076_v53 }
 0x556   :  { %v877_v62 = vadd.f32 %v862_v59, %v2063_v50  ;;  %v1608_v63 = vpop.f32.mrb[22].mxu0 }
 0x557   :  { %v880_v5 = vadd.f32 %v1608_v63, %v2081_v54  ;;  %v865_v3 = vpop.f32.mrb[23].mxu0  ;;  %v2183_v28 = vadd.f32 %v2167_v60, %v879_v4 }
 0x558   :  { %v878_v10 = vadd.f32 %v865_v3, %v2068_v51  ;;  %v2177_v21 = vadd.f32 %v2167_v60, %v877_v62 }
 0x559   :  { %v2174_v16 = vadd.f32 %v2167_v60, %v880_v5 }
 0x55a   :  { %v2180_v7 = vadd.f32 %v2167_v60, %v878_v10 }
 0x55b   :  { %v890_v53 = vpack.c.bf16 %v2174_v16, %v2183_v28 }
 0x55c   :  { %v889_v50 = vpack.c.bf16 %v2180_v7, %v2177_v21 }
 0x55e   :  { %1625 = vmatprep.mubr.bf16.mxu0 %v889_v50 }
 0x55f   :  { %1626 = vmatmul.mubr.bf16.vlgmr.msra.gmra.mrb[24].mxu0 %v890_v53 }
 0x560   :  { %1658 = vmatpush3.bf16.msra.mxu0 %v2099_v19 }
 0x561   :  { %1659 = vmatprep.subr.bf16.mxu0 %v2105_v26 }
 0x564   :  { %1660 = vmatpush3.bf16.msra.mxu0 %v2105_v26 }
 0x565   :  { %1665 = vmatprep.subr.bf16.mxu0 %v1999_v38 }
 0x632   :  { %v1627_v51 = vpop.f32.mrb[24].mxu0 }
 0x633   :  { %v934_v54 = vadd.f32 %v1627_v51, %v2123_v57  ;;  %v925_v11 = vpop.f32.mrb[25].mxu0 }
 0x634   :  { %v926_v12 = vadd.f32 %v925_v11, %v2127_v23  ;;  %v1628_v22 = vpop.f32.mrb[26].mxu0 }
 0x635   :  { %v1392_v24 = vmul.f32 -1.442695, %v934_v54  ;;  %v937_v13 = vadd.f32 %v1628_v22, %v2131_v1  ;;  %v928_v25 = vpop.f32.mrb[27].mxu0 }
 0x636   :  { %v1390_v20 = vmul.f32 -1.442695, %v926_v12  ;;  %v929_v14 = vadd.f32 %v928_v25, %v2135_v6 }
 0x637   :  { %1756 = vpow2.f32 %v1392_v24  ;;  %v1393_v27 = vmul.f32 -1.442695, %v937_v13 }
 0x638   :  { %1758 = vpow2.f32 %v1390_v20  ;;  %v1391_v29 = vmul.f32 -1.442695, %v929_v14 }
 0x639   :  { %1760 = vpow2.f32 %v1393_v27 }
 0x63a   :  { %1762 = vpow2.f32 %v1391_v29 }
 0x63b   :  { %1764 = vtanh.f32 %v934_v54 }
 0x63c   :  { %1766 = vtanh.f32 %v926_v12 }
 0x63d   :  { %1768 = vtanh.f32 %v937_v13 }
 0x641   :  { %v1757_v30 = vpop.eup %1756 }
 0x642   :  { %v1759_v31 = vpop.eup %1758  ;;  %v958_v57 = vadd.f32 1.0, %v1757_v30 }
 0x643   :  { %v956_v23 = vadd.f32 1.0, %v1759_v31  ;;  %v1761_v32 = vpop.eup %1760 }
 0x644   :  { %1770 = vrcp.f32 %v958_v57  ;;  %v959_v1 = vadd.f32 1.0, %v1761_v32  ;;  %v1763_v33 = vpop.eup %1762 }
 0x645   :  { %1772 = vrcp.f32 %v956_v23  ;;  %v957_v6 = vadd.f32 1.0, %v1763_v33  ;;  %v1765_v34 = vpop.eup %1764 }
 0x646   :  { %1774 = vrcp.f32 %v959_v1  ;;  %v1767_v35 = vpop.eup %1766 }
 0x647   :  { %1776 = vtanh.f32 %v929_v14  ;;  %v1769_v36 = vpop.eup %1768 }
 0x648   :  { %1778 = vrcp.f32 %v957_v6 }
 0x64e   :  { %v1771_v37 = vpop.eup %1770 }
 0x64f   :  { %v1773_v39 = vpop.eup %1772  ;;  %v970_v46 = vmul.f32 %v1771_v37, %v1765_v34 }
 0x650   :  { %v1775_v40 = vpop.eup %1774  ;;  %v968_v55 = vmul.f32 %v1773_v39, %v1767_v35 }
 0x651   :  { %v1777_v41 = vpop.eup %1776  ;;  %v971_v48 = vmul.f32 %v1775_v40, %v1769_v36 }
 0x652   :  { %v1779_v52 = vpop.eup %1778 }
 0x653   :  { %v969_v56 = vmul.f32 %v1779_v52, %v1777_v41  ;;  %v973_v59 = vpack.c.bf16 %v971_v48, %v970_v46 }
 0x655   :  { %v972_v62 = vpack.c.bf16 %v969_v56, %v968_v55 }
 0x657   :  { %1633 = vmatprep.mubr.msk.bf16.mxu1 %vm65_vm1, %v972_v62 }
 0x658   :  { %1634 = vmatmul.mubr.msk.bf16.vlgmr.msra.gmra.mrb[12].mxu1 %vm65_vm1, %v973_v59 }
 0x659   :  { %1638 = vmatpush3.bf16.msra.mxu1 %v1999_v38 }
 0x65a   :  { %1639 = vmatprep.subr.bf16.mxu1 %v2007_v42 }
 0x65d   :  { %1640 = vmatpush3.bf16.msra.mxu1 %v2007_v42 }
 0x65e   :  { %1641 = vmatprep.subr.bf16.mxu1 %v2015_v0 }
 0x661   :  { %1642 = vmatpush3.bf16.msra.mxu1 %v2015_v0 }
 0x662   :  { %1643 = vmatprep.subr.bf16.mxu1 %v2022_v43 }
 0x665   :  { %1644 = vmatpush3.bf16.msra.mxu1 %v2022_v43 }
 0x666   :  { %1645 = vmatprep.subr.bf16.mxu1 %v2029_v44 }
 0x669   :  { %1646 = vmatpush3.bf16.msra.mxu1 %v2029_v44 }
 0x66a   :  { %1647 = vmatprep.subr.bf16.mxu1 %v2036_v45 }
 0x66d   :  { %1648 = vmatpush3.bf16.msra.mxu1 %v2036_v45 }
 0x66e   :  { %1649 = vmatprep.subr.bf16.mxu1 %v2047_v47 }
 0x671   :  { %1650 = vmatpush3.bf16.msra.mxu1 %v2047_v47 }
 0x672   :  { %1651 = vmatprep.subr.bf16.mxu1 %v2057_v49 }
 0x675   :  { %1652 = vmatpush3.bf16.msra.mxu1 %v2057_v49 }
 0x676   :  { %1685 = vmatprep.subr.bf16.mxu1 %v2099_v19 }
 0x72b   :  { %v1635_v63 = vpop.f32.mrb[12].mxu1 }
 0x72c   :  { %v1014_v4 = vpop.f32.mrb[13].mxu1  ;;  %v1031_v10 = vadd.f32 %v1635_v63, %v2183_v28 }
 0x72d   :  { %v1029_v5 = vadd.f32 %v1014_v4, %v2177_v21  ;;  %v1636_v3 = vpop.f32.mrb[14].mxu1 }
 0x72e   :  { %v1032_v50 = vadd.f32 %v1636_v3, %v2174_v16  ;;  %v1017_v53 = vpop.f32.mrb[15].mxu1  ;;  %v2229_v22 = vadd.f32 %v1031_v10, %v2167_v60 }
 0x72f   :  { %v1030_v51 = vadd.f32 %v1017_v53, %v2180_v7  ;;  %v2223_v11 = vadd.f32 %v1029_v5, %v2167_v60 }
 0x730   :  { %v2220_v54 = vadd.f32 %v1032_v50, %v2167_v60 }
 0x731   :  { %v2226_v12 = vadd.f32 %v1030_v51, %v2167_v60 }
 0x732   :  { %v1038_v16 = vpack.c.bf16 %v2220_v54, %v2229_v22 }
 0x733   :  { %v1037_v21 = vpack.c.bf16 %v2226_v12, %v2223_v11 }
 0x735   :  { %1653 = vmatprep.mubr.bf16.mxu1 %v1037_v21 }
 0x736   :  { %1654 = vmatmul.mubr.bf16.vlgmr.msra.gmra.mrb[16].mxu1 %v1038_v16 }
 0x737   :  { %1686 = vmatpush3.bf16.msra.mxu1 %v2099_v19 }
 0x738   :  { %1687 = vmatprep.subr.bf16.mxu1 %v2105_v26 }
 0x73b   :  { %1688 = vmatpush3.bf16.msra.mxu1 %v2105_v26 }
 0x809   :  { %v1655_v7 = vpop.f32.mrb[16].mxu1 }
 0x80a   :  { %v1082_v28 = vadd.f32 %v1655_v7, %v2125_v58  ;;  %v1073_v24 = vpop.f32.mrb[17].mxu1 }
 0x80b   :  { %v1074_v13 = vadd.f32 %v1073_v24, %v2129_v61  ;;  %v1656_v25 = vpop.f32.mrb[18].mxu1 }
 0x80c   :  { %v1398_v20 = vmul.f32 -1.442695, %v1082_v28  ;;  %v1085_v14 = vadd.f32 %v1656_v25, %v2133_v2  ;;  %v1076_v27 = vpop.f32.mrb[19].mxu1 }
 0x80d   :  { %v1396_v29 = vmul.f32 -1.442695, %v1074_v13  ;;  %v1077_v30 = vadd.f32 %v1076_v27, %v2137_v9 }
 0x80e   :  { %1780 = vpow2.f32 %v1398_v20  ;;  %v1399_v19 = vmul.f32 -1.442695, %v1085_v14 }
 0x80f   :  { %1782 = vpow2.f32 %v1396_v29  ;;  %v1397_v31 = vmul.f32 -1.442695, %v1077_v30 }
 0x810   :  { %1784 = vpow2.f32 %v1399_v19 }
 0x811   :  { %1786 = vpow2.f32 %v1397_v31 }
 0x812   :  { %1788 = vtanh.f32 %v1082_v28 }
 0x813   :  { %1790 = vtanh.f32 %v1074_v13 }
 0x814   :  { %1792 = vtanh.f32 %v1085_v14 }
 0x818   :  { %v1781_v26 = vpop.eup %1780 }
 0x819   :  { %v1783_v57 = vpop.eup %1782  ;;  %v1106_v58 = vadd.f32 1.0, %v1781_v26 }
 0x81a   :  { %v1104_v61 = vadd.f32 1.0, %v1783_v57  ;;  %v1785_v23 = vpop.eup %1784 }
 0x81b   :  { %1794 = vrcp.f32 %v1106_v58  ;;  %v1107_v2 = vadd.f32 1.0, %v1785_v23  ;;  %v1787_v32 = vpop.eup %1786 }
 0x81c   :  { %1796 = vrcp.f32 %v1104_v61  ;;  %v1105_v9 = vadd.f32 1.0, %v1787_v32  ;;  %v1789_v1 = vpop.eup %1788 }
 0x81d   :  { %1798 = vrcp.f32 %v1107_v2  ;;  %v1791_v33 = vpop.eup %1790 }
 0x81e   :  { %1800 = vtanh.f32 %v1077_v30  ;;  %v1793_v6 = vpop.eup %1792 }
 0x81f   :  { %1802 = vrcp.f32 %v1105_v9 }
 0x825   :  { %v1795_v34 = vpop.eup %1794 }
 0x826   :  { %v1797_v35 = vpop.eup %1796  ;;  %v1118_v39 = vmul.f32 %v1795_v34, %v1789_v1 }
 0x827   :  { %v1799_v36 = vpop.eup %1798  ;;  %v1116_v46 = vmul.f32 %v1797_v35, %v1791_v33 }
 0x828   :  { %v1801_v37 = vpop.eup %1800  ;;  %v1119_v40 = vmul.f32 %v1799_v36, %v1793_v6 }
 0x829   :  { %v1803_v41 = vpop.eup %1802 }
 0x82a   :  { %v1117_v48 = vmul.f32 %v1803_v41, %v1801_v37  ;;  %v1121_v52 = vpack.c.bf16 %v1119_v40, %v1118_v39 }
 0x82c   :  { %v1120_v55 = vpack.c.bf16 %v1117_v48, %v1116_v46 }
 0x82e   :  { %1661 = vmatprep.mubr.msk.bf16.mxu0 %vm65_vm1, %v1120_v55 }
 0x82f   :  { %1662 = vmatmul.mubr.msk.bf16.vlgmr.msra.gmra.mrb[28].mxu0 %vm65_vm1, %v1121_v52 }
 0x830   :  { %1666 = vmatpush3.bf16.msra.mxu0 %v1999_v38 }
 0x831   :  { %1667 = vmatprep.subr.bf16.mxu0 %v2007_v42 }
 0x834   :  { %1668 = vmatpush3.bf16.msra.mxu0 %v2007_v42 }
 0x835   :  { %1669 = vmatprep.subr.bf16.mxu0 %v2015_v0 }
 0x838   :  { %1670 = vmatpush3.bf16.msra.mxu0 %v2015_v0 }
 0x839   :  { %1671 = vmatprep.subr.bf16.mxu0 %v2022_v43 }
 0x83c   :  { %1672 = vmatpush3.bf16.msra.mxu0 %v2022_v43 }
 0x83d   :  { %1673 = vmatprep.subr.bf16.mxu0 %v2029_v44 }
 0x840   :  { %1674 = vmatpush3.bf16.msra.mxu0 %v2029_v44 }
 0x841   :  { %1675 = vmatprep.subr.bf16.mxu0 %v2036_v45 }
 0x844   :  { %1676 = vmatpush3.bf16.msra.mxu0 %v2036_v45 }
 0x845   :  { %1677 = vmatprep.subr.bf16.mxu0 %v2047_v47 }
 0x848   :  { %1678 = vmatpush3.bf16.msra.mxu0 %v2047_v47 }
 0x849   :  { %1679 = vmatprep.subr.bf16.mxu0 %v2057_v49 }
 0x84c   :  { %1680 = vmatpush3.bf16.msra.mxu0 %v2057_v49 }
 0x902   :  { %v1663_v38 = vpop.f32.mrb[28].mxu0 }
 0x903   :  { %v1162_v42 = vpop.f32.mrb[29].mxu0  ;;  %v1179_v56 = vadd.f32 %v1663_v38, %v2229_v22 }
 0x904   :  { %v1177_v0 = vadd.f32 %v1162_v42, %v2223_v11  ;;  %v1664_v43 = vpop.f32.mrb[30].mxu0 }
 0x905   :  { %v1180_v44 = vadd.f32 %v1664_v43, %v2220_v54  ;;  %v1165_v59 = vpop.f32.mrb[31].mxu0  ;;  %v1183_v49 = vadd.f32 %v1179_v56, %v2167_v60 }
 0x906   :  { %v1178_v45 = vadd.f32 %v1165_v59, %v2226_v12  ;;  %v1181_v47 = vadd.f32 %v1177_v0, %v2167_v60 }
 0x907   :  { %v2264_v62 = vadd.f32 %v1180_v44, %v2167_v60 }
 0x908   :  { %v2268_v63 = vadd.f32 %v1178_v45, %v2167_v60 }
 0x909   :  { %v1186_v5 = vpack.c.bf16 %v2264_v62, %v1183_v49 }
 0x90a   :  { %v1185_v4 = vpack.c.bf16 %v2268_v63, %v1181_v47 }
 0x90c   :  { %1681 = vmatprep.mubr.bf16.mxu0 %v1185_v4 }
 0x90d   :  { %1682 = vmatmul.mubr.bf16.vlgmr.msra.gmra.mrb[32].mxu0 %v1186_v5 }
 0x9e0   :  { %v1683_v3 = vpop.f32.mrb[32].mxu0 }
 0x9e1   :  { %v1230_v10 = vadd.f32 %v1683_v3, %v2139_v15  ;;  %v1221_v50 = vpop.f32.mrb[33].mxu0 }
 0x9e2   :  { %v1222_v53 = vadd.f32 %v1221_v50, %v2141_v17  ;;  %v1684_v51 = vpop.f32.mrb[34].mxu0 }
 0x9e3   :  { %v1404_v54 = vmul.f32 -1.442695, %v1230_v10  ;;  %v1233_v11 = vadd.f32 %v1684_v51, %v2143_v18  ;;  %v1224_v12 = vpop.f32.mrb[35].mxu0 }
 0x9e4   :  { %v1402_v22 = vmul.f32 -1.442695, %v1222_v53  ;;  %v1225_v21 = vadd.f32 %v1224_v12, %v2145_v8 }
 0x9e5   :  { %1804 = vpow2.f32 %v1404_v54  ;;  %v1405_v16 = vmul.f32 -1.442695, %v1233_v11 }
 0x9e6   :  { %1806 = vpow2.f32 %v1402_v22  ;;  %v1403_v7 = vmul.f32 -1.442695, %v1225_v21 }
 0x9e7   :  { %1808 = vpow2.f32 %v1405_v16 }
 0x9e8   :  { %1810 = vpow2.f32 %v1403_v7 }
 0x9e9   :  { %1812 = vtanh.f32 %v1230_v10 }
 0x9ea   :  { %1814 = vtanh.f32 %v1222_v53 }
 0x9eb   :  { %1816 = vtanh.f32 %v1233_v11 }
 0x9ef   :  { %v1805_v28 = vpop.eup %1804 }
 0x9f0   :  { %v1807_v24 = vpop.eup %1806  ;;  %v1254_v15 = vadd.f32 1.0, %v1805_v28 }
 0x9f1   :  { %v1252_v17 = vadd.f32 1.0, %v1807_v24  ;;  %v1809_v13 = vpop.eup %1808 }
 0x9f2   :  { %1818 = vrcp.f32 %v1254_v15  ;;  %v1255_v18 = vadd.f32 1.0, %v1809_v13  ;;  %v1811_v25 = vpop.eup %1810 }
 0x9f3   :  { %1820 = vrcp.f32 %v1252_v17  ;;  %v1253_v8 = vadd.f32 1.0, %v1811_v25  ;;  %v1813_v20 = vpop.eup %1812 }
 0x9f4   :  { %1822 = vrcp.f32 %v1255_v18  ;;  %v1815_v14 = vpop.eup %1814 }
 0x9f5   :  { %1824 = vtanh.f32 %v1225_v21  ;;  %v1817_v27 = vpop.eup %1816 }
 0x9f6   :  { %1826 = vrcp.f32 %v1253_v8 }
 0x9fc   :  { %v1819_v29 = vpop.eup %1818 }
 0x9fd   :  { %v1821_v30 = vpop.eup %1820  ;;  %v1266_v26 = vmul.f32 %v1819_v29, %v1813_v20 }
 0x9fe   :  { %v1823_v19 = vpop.eup %1822  ;;  %v1264_v61 = vmul.f32 %v1821_v30, %v1815_v14 }
 0x9ff   :  { %v1825_v31 = vpop.eup %1824  ;;  %v1267_v57 = vmul.f32 %v1823_v19, %v1817_v27 }
 0xa00   :  { %v1827_v58 = vpop.eup %1826 }
 0xa01   :  { %v1265_v23 = vmul.f32 %v1827_v58, %v1825_v31  ;;  %v1269_v2 = vpack.c.bf16 %v1267_v57, %v1266_v26 }
 0xa03   :  { %v1268_v32 = vpack.c.bf16 %v1265_v23, %v1264_v61 }
 0xa05   :  { %1689 = vmatprep.mubr.msk.bf16.mxu1 %vm65_vm1, %v1268_v32 }
 0xa06   :  { %1690 = vmatmul.mubr.msk.bf16.vlgmr.msra.gmra.mrb[20].mxu1 %vm65_vm1, %v1269_v2 }
 0xad9   :  { %v1691_v9 = vpop.f32.mrb[20].mxu1 }
 0xada   :  { %v1327_v1 = vadd.f32 %v1691_v9, %v1183_v49  ;;  %v1310_v33 = vpop.f32.mrb[21].mxu1 }
 0xadb   :  { %v1325_v6 = vadd.f32 %v1310_v33, %v1181_v47  ;;  %v1692_v34 = vpop.f32.mrb[22].mxu1 }
 0xadc   :  { %v1331_v35 = vadd.f32 %v1327_v1, %v2167_v60  ;;  %v1328_v36 = vadd.f32 %v1692_v34, %v2264_v62  ;;  %v1313_v37 = vpop.f32.mrb[23].mxu1 }
 0xadd   :  { %v1329_v39 = vadd.f32 %v1325_v6, %v2167_v60  ;;  %v1326_v40 = vadd.f32 %v1313_v37, %v2268_v63 }
 0xade   :  { %1335 = vst [vmem:[%s2302_s5 + $0x10] sm:$0xff] %v1331_v35  ;;  %v1332_v41 = vadd.f32 %v1328_v36, %v2167_v60 }
 0xadf   :  { %1333 = vst [vmem:[%s2302_s5] sm:$0xff] %v1329_v39  ;;  %v1330_v46 = vadd.f32 %v1326_v40, %v2167_v60 }
 0xae0   :  { %1336 = vst [vmem:[%s2302_s5 + $0x18] sm:$0xff] %v1332_v41 }
 0xae1   :  { %1334 = vst [vmem:[%s2302_s5 + $0x8] sm:$0xff] %v1330_v46 }

</bundles_post_ra>
